<compile_context>
chip_gen: v7x
topology: tpu7x:2x2x1
jax: 0.10.0
libtpu: 0.0.40
codegen_flags: <defaults>
</compile_context>

<pallas_src>
import functools

import jax
import jax.numpy as jnp
from jax.experimental import pallas as pl
from jax.experimental.pallas import tpu as pltpu

EPS = 1e-6
_VMEM_LIMIT_BYTES = 48 * 1024 * 1024  # explicit scoped-VMEM raise; safe on v7x (64 MiB phys)
_VMEM_BLOCK_BUDGET = 24 * 1024 * 1024  # total budget for the live (double-buffered) blocks


def _sublane_multiple(itemsize: int) -> int:
    # sublane packing minimum: 8 rows for 4-byte, 16 for bf16, 32 for int8
    return max(8, 32 // max(int(itemsize), 1))


def _choose_block_rows(rows: int, d: int, itemsize: int, *, n_live: int) -> int:
    """Largest dtype-aligned row tile such that all live (double-buffered) blocks fit VMEM."""
    sub = _sublane_multiple(itemsize)
    bytes_per_row = d * 4  # conservative: count blocks at 4 B/elem (f32 / uint32 bits)
    cap = _VMEM_BLOCK_BUDGET // max(n_live * bytes_per_row, 1)
    cap = min(cap, 1024, rows)
    return max(sub, (cap // sub) * sub)


# ---------------------------------------------------------------------------
# Kernel 1: LayerNormalization over the last (feature) axis.
# ---------------------------------------------------------------------------
def _layernorm_kernel(alpha_ref, bias_ref, x_ref, o_ref):
    x = x_ref[...].astype(jnp.float32)
    d = x.shape[-1]
    mean = jnp.mean(x, axis=-1, keepdims=True)
    diff = x - mean
    # unbiased variance (n-1) to match torch.Tensor.std() default
    var = jnp.sum(diff * diff, axis=-1, keepdims=True) * (1.0 / (d - 1))
    # one reciprocal per ROW (shape [rows, 1]) then a broadcast multiply,
    # instead of a full [rows, D] divide on the vector critical path.
    inv = 1.0 / (jnp.sqrt(var) + EPS)
    y = (alpha_ref[0] * inv) * diff + bias_ref[0]
    o_ref[...] = y.astype(o_ref.dtype)


def layer_norm(x2d, alpha, bias, *, block_rows=None):
    rows, d = x2d.shape
    if block_rows is None:
        # 1 tensor input + 1 output, double-buffered -> 4 live blocks
        block_rows = _choose_block_rows(rows, d, x2d.dtype.itemsize, n_live=4)
    blk = pl.BlockSpec((block_rows, d), lambda i: (i, 0))
    return pl.pallas_call(
        _layernorm_kernel,
        out_shape=jax.ShapeDtypeStruct((rows, d), x2d.dtype),
        grid=(pl.cdiv(rows, block_rows),),
        in_specs=[
            pl.BlockSpec(memory_space=pltpu.MemorySpace.SMEM),  # alpha (1,)
            pl.BlockSpec(memory_space=pltpu.MemorySpace.SMEM),  # bias  (1,)
            blk,
        ],
        out_specs=blk,
        compiler_params=pltpu.CompilerParams(
            dimension_semantics=("parallel",),  # independent row tiles -> both TCs on v7x
            vmem_limit_bytes=_VMEM_LIMIT_BYTES,
        ),
    )(alpha, bias, x2d)


# ---------------------------------------------------------------------------
# Kernel 2: residual add, optionally with inverted dropout on the sublayer out.
#   out = x + dropout_p(y)
# ---------------------------------------------------------------------------
def _residual_add_kernel(x_ref, y_ref, o_ref):
    x = x_ref[...].astype(jnp.float32)
    y = y_ref[...].astype(jnp.float32)
    o_ref[...] = (x + y).astype(o_ref.dtype)


def _residual_dropout_kernel(x_ref, y_ref, bits_ref, o_ref, *, threshold, scale):
    x = x_ref[...].astype(jnp.float32)
    y = y_ref[...].astype(jnp.float32)
    # integer-threshold keep mask: P(bits >= p*2^32) = 1 - p
    keep = bits_ref[...] >= jnp.uint32(threshold)
    y = jnp.where(keep, y * scale, 0.0)
    o_ref[...] = (x + y).astype(o_ref.dtype)


def residual_add_dropout(x2d, y2d, p, key=None, *, block_rows=None):
    rows, d = x2d.shape
    p = float(p)
    cparams = pltpu.CompilerParams(
        dimension_semantics=("parallel",),
        vmem_limit_bytes=_VMEM_LIMIT_BYTES,
    )

    if p <= 0.0:
        if block_rows is None:
            block_rows = _choose_block_rows(rows, d, x2d.dtype.itemsize, n_live=6)
        blk = pl.BlockSpec((block_rows, d), lambda i: (i, 0))
        return pl.pallas_call(
            _residual_add_kernel,
            out_shape=jax.ShapeDtypeStruct((rows, d), x2d.dtype),
            grid=(pl.cdiv(rows, block_rows),),
            in_specs=[blk, blk],
            out_specs=blk,
            compiler_params=cparams,
        )(x2d, y2d)

    if key is None:
        key = jax.random.PRNGKey(0)
    # TODO(synk): on a pure-TPU deployment the bits could be drawn in-kernel via
    # pltpu.prng_seed/prng_random_bits to save one full-tensor HBM read; that
    # primitive has no CPU-interpret lowering, so bits are streamed in here.
    bits = jax.random.bits(key, (rows, d), dtype=jnp.uint32)
    threshold = min(int(round(p * 2.0**32)), 2**32 - 1)
    scale = 1.0 / (1.0 - p)

    if block_rows is None:
        block_rows = _choose_block_rows(rows, d, x2d.dtype.itemsize, n_live=8)
    blk = pl.BlockSpec((block_rows, d), lambda i: (i, 0))
    kernel = functools.partial(_residual_dropout_kernel, threshold=threshold, scale=scale)
    return pl.pallas_call(
        kernel,
        out_shape=jax.ShapeDtypeStruct((rows, d), x2d.dtype),
        grid=(pl.cdiv(rows, block_rows),),
        in_specs=[blk, blk, blk],
        out_specs=blk,
        compiler_params=cparams,
    )(x2d, y2d, bits)


# ---------------------------------------------------------------------------
# Module wrapper
# ---------------------------------------------------------------------------
class ResidualConnection:
    """x + dropout(sublayer(norm(x))), norm = LayerNormalization()."""

    def __init__(self, dropout: float):
        self.p = float(dropout)
        # LayerNormalization parameters: alpha = ones(1), bias = zeros(1)
        self.alpha = jnp.ones((1,), jnp.float32)
        self.bias = jnp.zeros((1,), jnp.float32)

    def __call__(self, x, sublayer, *, key=None, training=True):
        b, s, d = x.shape
        rows = b * s
        sub = _sublane_multiple(x.dtype.itemsize)
        pad = (-rows) % sub

        x2d = x.reshape(rows, d)
        x2d_p = jnp.pad(x2d, ((0, pad), (0, 0))) if pad else x2d

        normed = layer_norm(x2d_p, self.alpha, self.bias)
        normed = (normed[:rows] if pad else normed).reshape(b, s, d)

        y = sublayer(normed)  # arbitrary sublayer: plain-JAX glue
        y2d = y.reshape(rows, d)
        y2d_p = jnp.pad(y2d, ((0, pad), (0, 0))) if pad else y2d

        p = self.p if training else 0.0
        out2d = residual_add_dropout(x2d_p, y2d_p, p, key=key)
        out2d = out2d[:rows] if pad else out2d
        return out2d.reshape(b, s, d)


# ---------------------------------------------------------------------------
# Pure-JAX reference (eval mode: dropout is identity)
# ---------------------------------------------------------------------------
def _reference_eval(x, sublayer, alpha, bias):
    mean = jnp.mean(x, axis=-1, keepdims=True)
    var = jnp.sum((x - mean) ** 2, axis=-1, keepdims=True) / (x.shape[-1] - 1)
    normed = alpha[0] * (x - mean) / (jnp.sqrt(var) + EPS) + bias[0]
    return x + sublayer(normed)


if __name__ == "__main__":
    key = jax.random.PRNGKey(0)
    k_x, k_w = jax.random.split(key)

    B, S, D = 2, 8, 32  # batch, seq, hidden  (real workloads: make D a multiple of 128)
    x = jax.random.normal(k_x, (B, S, D), jnp.float32)

    # Deterministic "sublayer": a simple linear projection.
    W = jax.random.normal(k_w, (D, D), jnp.float32) * 0.02
    bvec = jnp.zeros((D,), jnp.float32)
    sublayer = lambda h: jnp.einsum("bsd,de->bse", h, W) + bvec

    block = ResidualConnection(dropout=0.1)

    # Eval mode (dropout = identity): check against pure-JAX reference.
    out_eval = jax.block_until_ready(block(x, sublayer, training=False))
    ref_eval = _reference_eval(x, sublayer, block.alpha, block.bias)
    assert jnp.allclose(out_eval, ref_eval, atol=1e-5, rtol=1e-5), "mismatch vs reference"

    # Training mode: exercises the masked-dropout residual kernel.
    out_train = jax.block_until_ready(
        block(x, sublayer, key=jax.random.PRNGKey(123), training=True)
    )
    assert out_train.shape == x.shape and bool(jnp.all(jnp.isfinite(out_train)))

    print("KERNEL_OK")
</pallas_src>

<mosaic_0001>
module attributes {stable_mosaic.version = 11 : i64} {
  func.func @_layernorm_kernel(%arg0: i32, %arg1: memref<1xf32, #tpu.memory_space<smem>>, %arg2: memref<1xf32, #tpu.memory_space<smem>>, %arg3: memref<16x32xf32, #tpu.memory_space<vmem>>, %arg4: memref<16x32xf32, #tpu.memory_space<vmem>>) attributes {dimension_semantics = [#tpu.dimension_semantics<parallel>], iteration_bounds = array<i64: 1>, scalar_prefetch = 0 : i64, scratch_operands = 0 : i64, tpu.core_type = #tpu.core_type<tc>, window_params = [{transform_indices = @transform_0, window_bounds = array<i64: 1>}, {transform_indices = @transform_1, window_bounds = array<i64: 1>}, {transform_indices = @transform_2, window_bounds = array<i64: 16, 32>}, {transform_indices = @transform_3, window_bounds = array<i64: 16, 32>}]} {
    %c0 = arith.constant 0 : index
    %c0_0 = arith.constant 0 : index
    %0 = vector.load %arg3[%c0, %c0_0] : memref<16x32xf32, #tpu.memory_space<vmem>>, vector<16x32xf32>
    %cst = arith.constant dense<0.000000e+00> : vector<16xf32>
    %1 = vector.multi_reduction <add>, %0, %cst [1] : vector<16x32xf32> to vector<16xf32>
    %2 = vector.shape_cast %1 : vector<16xf32> to vector<16x1xf32>
    %cst_1 = arith.constant 3.200000e+01 : f32
    %3 = vector.broadcast %cst_1 : f32 to vector<16x1xf32>
    %4 = arith.divf %2, %3 : vector<16x1xf32>
    %5 = vector.broadcast %4 : vector<16x1xf32> to vector<16x32xf32>
    %6 = arith.subf %0, %5 : vector<16x32xf32>
    %7 = arith.mulf %6, %6 : vector<16x32xf32>
    %cst_2 = arith.constant dense<0.000000e+00> : vector<16xf32>
    %8 = vector.multi_reduction <add>, %7, %cst_2 [1] : vector<16x32xf32> to vector<16xf32>
    %9 = vector.shape_cast %8 : vector<16xf32> to vector<16x1xf32>
    %cst_3 = arith.constant 0.0322580636 : f32
    %10 = vector.broadcast %cst_3 : f32 to vector<16x1xf32>
    %11 = arith.mulf %9, %10 : vector<16x1xf32>
    %12 = math.sqrt %11 : vector<16x1xf32>
    %cst_4 = arith.constant 9.99999997E-7 : f32
    %13 = vector.broadcast %cst_4 : f32 to vector<16x1xf32>
    %14 = arith.addf %12, %13 : vector<16x1xf32>
    %cst_5 = arith.constant 1.000000e+00 : f32
    %15 = vector.broadcast %cst_5 : f32 to vector<16x1xf32>
    %16 = arith.divf %15, %14 : vector<16x1xf32>
    %c0_6 = arith.constant 0 : index
    %17 = memref.load %arg1[%c0_6] : memref<1xf32, #tpu.memory_space<smem>>
    %18 = vector.broadcast %17 : f32 to vector<16x1xf32>
    %19 = arith.mulf %18, %16 : vector<16x1xf32>
    %20 = vector.broadcast %19 : vector<16x1xf32> to vector<16x32xf32>
    %21 = arith.mulf %20, %6 : vector<16x32xf32>
    %c0_7 = arith.constant 0 : index
    %22 = memref.load %arg2[%c0_7] : memref<1xf32, #tpu.memory_space<smem>>
    %23 = vector.broadcast %22 : f32 to vector<16x32xf32>
    %24 = arith.addf %21, %23 : vector<16x32xf32>
    %c0_8 = arith.constant 0 : index
    %c0_9 = arith.constant 0 : index
    %25 = vector.load %arg4[%c0_8, %c0_9] : memref<16x32xf32, #tpu.memory_space<vmem>>, vector<16x32xf32>
    tpu.vector_store %arg4[%c0_8, %c0_9], %24 {strides = array<i32>} : memref<16x32xf32, #tpu.memory_space<vmem>>, vector<16x32xf32>,
    return
  }
  func.func @transform_0(%arg0: i32) -> i32 {
    %c0_i32 = arith.constant 0 : i32
    %c0_i32_0 = arith.constant 0 : i32
    return %c0_i32 : i32
  }
  func.func @transform_1(%arg0: i32) -> i32 {
    %c0_i32 = arith.constant 0 : i32
    %c0_i32_0 = arith.constant 0 : i32
    return %c0_i32 : i32
  }
  func.func @transform_2(%arg0: i32) -> (i32, i32) {
    %c0_i32 = arith.constant 0 : i32
    %c0_i32_0 = arith.constant 0 : i32
    return %arg0, %c0_i32 : i32, i32
  }
  func.func @transform_3(%arg0: i32) -> (i32, i32) {
    %c0_i32 = arith.constant 0 : i32
    %c0_i32_0 = arith.constant 0 : i32
    return %arg0, %c0_i32 : i32, i32
  }
}

</mosaic_0001>

<bundles_post_ra>
// kernel: tpu_custom_call.1
= control target key start
LH: loop header
LB: loop body
LE: loop exit
PB: predicated region body
PF: predicated region fallthrough
CT: control target
= control target key end

     0   :  { %10 = vsyncpa [#allocation5], 0  ;;  %s230_s0 = inlined_call_operand.<no memory space> [shape: f32[1], index: 0, kind: input, shape index: {}]   ;;  %s231_s1 = inlined_call_operand.<no memory space> [shape: f32[1], index: 1, kind: input, shape index: {}]   ;;  %s232_s2 = inlined_call_operand.hbm [shape: f32[16,32], index: 2, kind: input, shape index: {}]   ;;  %s233_s3 = inlined_call_operand.hbm [shape: f32[16,32], index: 3, kind: output, shape index: {}]  }
   0x1   :  { %11 = vsyncpa [#allocation6], 0  ;;  %s164_s12 = smov [#allocation4]   ;;  %s116_s16 = scalar_lea.hbm %s232_s2, 256 }
   0x2   :  { %s21_s13 = sshll.u32 %s164_s12, 4  ;;  %p117_p0 = scmp.ne.s32.totalorder %s232_s2, %s116_s16  ;;  %s22_s13 = int_to_ptr.vmem [resolvable:$true] %s21_s13 }
   0x3   :  { %p120_p1 = scmp.lt.u32.totalorder %s116_s16, %s232_s2 }
   0x5   :  { %p122_p2 = pnand %p120_p1, %p117_p0 }
   0x7   :  { %125 = shalt.err (!%p122_p2)
}
   0x8   :  { %s126_s21 = scalar_lea.vmem %s22_s13, 256  ;;  %p131_p4 = scmp.lt.s32.totalorder %s22_s13, %s22_s13 }
   0x9   :  { %p127_p3 = scmp.ne.s32.totalorder %s22_s13, %s126_s21  ;;  %p132_p5 = scmp.lt.s32.totalorder %s126_s21, %s126_s21 }
   0xb   :  { %p133_p6 = por %p132_p5, %p131_p4 }
   0xd   :  { %p134_p7 = pnand %p133_p6, %p127_p3 }
   0xf   :  { %137 = shalt.err (!%p134_p7)
}
  0x10   :  { %s165_s22 = smov 128   ;;  %s166_s23 = smov 8  }
  0x11   :  { %27 = dma.hbm_to_vmem [thread:$0]  %s232_s2, 256, %s22_s13, [#allocation5], %s165_s22, %s165_s22, %s166_s23  }
  0x12   :  { %160 = dma.done.wait [#allocation5], 256  }
  0x13   :  { %161 = vsyncadd [#allocation5], 4294967040  ;;  %vm33_vm0 = vcmask 261120   ;;  %v31_v0 = vld [vmem:[#allocation4] sm:$0xff]  ;;  %v32_v1 = vld [vmem:[#allocation4 + $0x8] sm:$0xff]  ;;  %v76_v30 = vstv %s230_s0  ;;  %v82_v33 = vstv %s231_s1  ;;  %s167_s29 = smov [#allocation7]  }
  0x14   :  { %v34_v2 = vsel %vm33_vm0, %v31_v0, 0.0  ;;  %v37_v3 = vsel %vm33_vm0, %v32_v1, 0.0  ;;  %s92_s30 = sshll.u32 %s167_s29, 4  ;;  %s93_s30 = int_to_ptr.vmem [resolvable:$true] %s92_s30 }
  0x15   :  { %35 = vadd.xlane.f32.xlu0 %v34_v2  ;;  %s138_s0 = scalar_lea.vmem %s93_s30, 256  ;;  %p143_p9 = scmp.lt.s32.totalorder %s93_s30, %s93_s30 }
  0x16   :  { %p139_p8 = scmp.ne.s32.totalorder %s93_s30, %s138_s0  ;;  %p144_p10 = scmp.lt.s32.totalorder %s138_s0, %s138_s0 }
  0x18   :  { %p145_p11 = por %p144_p10, %p143_p9 }
  0x19   :  { %38 = vadd.xlane.f32.xlu0 %v37_v3 }
  0x1a   :  { %p146_p12 = pnand %p145_p11, %p139_p8 }
  0xa2   :  { %v36_v4 = vpop.xlane.xlu0 %35 }
  0xa3   :  { %v41_v5 = vmul.f32 0.03125, %v36_v4 }
  0xa5   :  { %v43_v6 = vsub.f32 %v31_v0, %v41_v5 }
  0xa6   :  { %v39_v7 = vpop.xlane.xlu0 %38 }
  0xa7   :  { %v42_v8 = vmul.f32 0.03125, %v39_v7  ;;  %v45_v9 = vmul.f32 %v43_v6, %v43_v6 }
  0xa9   :  { %v44_v10 = vsub.f32 %v32_v1, %v42_v8  ;;  %v47_v11 = vsel %vm33_vm0, %v45_v9, 0.0 }
  0xaa   :  { %48 = vadd.xlane.f32.xlu1 %v47_v11 }
  0xab   :  { %v46_v12 = vmul.f32 %v44_v10, %v44_v10 }
  0xad   :  { %v50_v13 = vsel %vm33_vm0, %v46_v12, 0.0 }
  0xae   :  { %51 = vadd.xlane.f32.xlu1 %v50_v13 }
 0x137   :  { %v49_v14 = vpop.xlane.xlu1 %48 }
 0x138   :  { %v53_v15 = vmul.f32 0.032258064, %v49_v14 }
 0x13a   :  { %108 = vrsqrt.f32 %v53_v15  ;;  %vm57_vm1 = vcmp.eq.f32.partialorder %v53_v15, inf  ;;  %v60_v20 = vand.u32 2147483648, %v53_v15  ;;  %vm59_vm2 = vcmp.eq.f32.partialorder %v53_v15, 0.0 }
 0x13b   :  { %v52_v16 = vpop.xlane.xlu1 %51 }
 0x13c   :  { %v54_v17 = vmul.f32 0.032258064, %v52_v16 }
 0x13e   :  { %110 = vrsqrt.f32 %v54_v17  ;;  %vm64_vm3 = vcmp.eq.f32.partialorder %v54_v17, inf  ;;  %v67_v26 = vand.u32 2147483648, %v54_v17  ;;  %vm66_vm4 = vcmp.eq.f32.partialorder %v54_v17, 0.0 }
 0x144   :  { %v109_v18 = vpop.eup %108 }
 0x145   :  { %v56_v19 = vmul.f32 %v109_v18, %v53_v15 }
 0x147   :  { %v58_v21 = vsel %vm57_vm1, %v53_v15, %v56_v19 }
 0x148   :  { %v111_v22 = vpop.eup %110  ;;  %v61_v23 = vsel %vm59_vm2, %v60_v20, %v58_v21 }
 0x149   :  { %v69_v24 = vadd.f32 1e-06, %v61_v23  ;;  %v63_v25 = vmul.f32 %v111_v22, %v54_v17 }
 0x14b   :  { %112 = vrcp.f32 %v69_v24  ;;  %v65_v27 = vsel %vm64_vm3, %v54_v17, %v63_v25 }
 0x14c   :  { %v68_v28 = vsel %vm66_vm4, %v67_v26, %v65_v27 }
 0x14d   :  { %v70_v29 = vadd.f32 1e-06, %v68_v28 }
 0x14f   :  { %114 = vrcp.f32 %v70_v29 }
 0x155   :  { %v113_v31 = vpop.eup %112 }
 0x156   :  { %v77_v32 = vmul.f32 %v113_v31, %v76_v30 }
 0x158   :  { %v79_v34 = vmul.f32 %v77_v32, %v43_v6 }
 0x159   :  { %v115_v35 = vpop.eup %114 }
 0x15a   :  { %v78_v36 = vmul.f32 %v115_v35, %v76_v30  ;;  %v83_v37 = vadd.f32 %v82_v33, %v79_v34 }
 0x15c   :  { %v80_v38 = vmul.f32 %v78_v36, %v44_v10  ;;  %85 = vst.msk [vmem:[#allocation7] sm:$0xff] %vm33_vm0, %v83_v37 }
 0x15e   :  { %v84_v39 = vadd.f32 %v82_v33, %v80_v38 }
 0x160   :  { %86 = vst.msk [vmem:[#allocation7 + $0x8] sm:$0xff] %vm33_vm0, %v84_v39 }
 0x161   :  { %149 = shalt.err (!%p146_p12)
}
 0x162   :  { %s150_s5 = scalar_lea.hbm %s233_s3, 256 }
 0x163   :  { %p151_p13 = scmp.ne.s32.totalorder %s233_s3, %s150_s5  ;;  %p154_p0 = scmp.lt.u32.totalorder %s150_s5, %s233_s3 }
 0x165   :  { %p156_p1 = pnand %p154_p0, %p151_p13 }
 0x167   :  { %159 = shalt.err (!%p156_p1)
}
 0x168   :  { %98 = dma.vmem_to_hbm [thread:$0]  %s93_s30, 256, %s233_s3, [#allocation6], %s165_s22, %s165_s22, %s166_s23  }
 0x169   :  { %162 = dma.done.wait [#allocation6], 256  }
 0x16a   :  { %163 = vsyncadd [#allocation6], 4294967040 }
 0x16b   :  { %102 = vsyncpa [#allocation5], 1 }
 0x16c   :  { %103 = vsyncpa [#allocation6], 1 }

</bundles_post_ra>
